<compile_context>
chip_gen: v7x
topology: tpu7x:2x2x1
jax: 0.10.0
libtpu: 0.0.40
codegen_flags: <defaults>
</compile_context>

<pallas_src>
import functools

import jax
import jax.numpy as jnp
from jax.experimental import pallas as pl
from jax.experimental.pallas import tpu as pltpu


def _critic_kernel(x_ref, w14_ref, b14_ref, w2_ref, b2_ref, w5_ref, b5_ref,
                   w36_ref, b36_ref, out_ref, *, hidden):
    H = hidden
    ep = b14_ref.dtype  # epilogue dtype: bf16 on v6e/v7x, fp32 on v5e and older

    x = x_ref[...].astype(jnp.bfloat16)

    # Fused layer 1 for both heads: [B, 2H] = x @ w14 + b14, ReLU.
    hg = jnp.dot(x, w14_ref[...], preferred_element_type=jnp.float32)
    hg = jnp.maximum(hg.astype(ep) + b14_ref[...], 0.0).astype(jnp.bfloat16)

    # Split heads along the lane axis (H = 256, a clean vreg boundary).
    h = hg[:, :H]
    g = hg[:, H:]

    # Layer 2 per head (fp32 MXU accumulation, epilogue in `ep`).
    h2 = jnp.dot(h, w2_ref[...], preferred_element_type=jnp.float32)
    h2 = jnp.maximum(h2.astype(ep) + b2_ref[...], 0.0).astype(jnp.bfloat16)
    g2 = jnp.dot(g, w5_ref[...], preferred_element_type=jnp.float32)
    g2 = jnp.maximum(g2.astype(ep) + b5_ref[...], 0.0).astype(jnp.bfloat16)

    # Fused output layer: [h2 | g2] @ block-diag(w3, w6) + [b3 | b6] -> [B, 2].
    hg2 = jnp.concatenate([h2, g2], axis=-1)                     # [B, 2H] bf16
    out_ref[...] = (jnp.dot(hg2, w36_ref[...],
                            preferred_element_type=jnp.float32)
                    + b36_ref[...])


def _has_bf16_vpu():
    """True on chips with a native bf16 VPU (v6e/v7x); v2-v5 stay fp32."""
    try:
        kind = jax.devices()[0].device_kind.lower()
    except Exception:
        return False
    return not any(tag in kind for tag in ("v2", "v3", "v4", "v5"))


def critic_forward(state, action, params, *, hidden=256, block_b=None,
                   bf16_epilogue=None):
    """state: [B, state_dim] fp32, action: [B, action_dim] fp32.

    params: dict with w1..w6 ([in, out], fp32) and b1..b6 ([1, out], fp32).
    Returns (q1, q2), each [B, 1] fp32 — identical semantics to the PyTorch
    Critic forward (twin Q heads on concat([state, action])).
    """
    B, state_dim = state.shape
    action_dim = action.shape[1]
    D = state_dim + action_dim
    H = hidden

    if bf16_epilogue is None:
        bf16_epilogue = _has_bf16_vpu()
    ep_dtype = jnp.bfloat16 if bf16_epilogue else jnp.float32

    # --- pack / cast parameters & input (cheap XLA glue, fused under jit) ----
    x = jnp.concatenate([state, action], axis=-1)                  # [B, D] fp32
    w14 = jnp.concatenate([params["w1"], params["w4"]],
                          axis=1).astype(jnp.bfloat16)             # [D, 2H]
    b14 = jnp.concatenate([params["b1"], params["b4"]],
                          axis=1).astype(ep_dtype)                 # [1, 2H]
    w2 = params["w2"].astype(jnp.bfloat16)                         # [H, H]
    w5 = params["w5"].astype(jnp.bfloat16)                         # [H, H]
    b2 = params["b2"].astype(ep_dtype)                             # [1, H]
    b5 = params["b5"].astype(ep_dtype)                             # [1, H]

    zeros = jnp.zeros((H, 1), jnp.float32)
    w36 = jnp.concatenate(
        [jnp.concatenate([params["w3"], zeros], axis=1),
         jnp.concatenate([zeros, params["w6"]], axis=1)],
        axis=0).astype(jnp.bfloat16)                               # [2H, 2]
    b36 = jnp.concatenate([params["b3"], params["b6"]], axis=1)    # [1, 2] fp32

    # --- batch-tiled grid; weights stay VMEM-resident -------------------------
    if block_b is None:
        # Cap 512: fits every generation's scoped-VMEM default; B > 512 gives
        # >= 2 grid steps so the parallel axis uses both v7x TensorCores.
        block_b = min(B, 512)
    grid = (pl.cdiv(B, block_b),)

    flops = 2 * B * (D * 2 * H + 2 * H * H + 2 * H * 2)
    bytes_accessed = (B * D * 4 + B * 2 * 4                        # x in, q out
                      + 2 * (D * 2 * H + 2 * H * H + 2 * H * 2)    # bf16 weights
                      + 4 * (2 * H + 2 * H + 2))                   # biases
    cost = pl.CostEstimate(flops=flops, transcendentals=0,
                           bytes_accessed=bytes_accessed)

    kernel = functools.partial(_critic_kernel, hidden=H)

    q = pl.pallas_call(
        kernel,
        out_shape=jax.ShapeDtypeStruct((B, 2), jnp.float32),
        grid=grid,
        in_specs=[
            pl.BlockSpec((block_b, D), lambda i: (i, 0)),          # x
            pl.BlockSpec((D, 2 * H), lambda i: (0, 0)),            # w14
            pl.BlockSpec((1, 2 * H), lambda i: (0, 0)),            # b14
            pl.BlockSpec((H, H), lambda i: (0, 0)),                # w2
            pl.BlockSpec((1, H), lambda i: (0, 0)),                # b2
            pl.BlockSpec((H, H), lambda i: (0, 0)),                # w5
            pl.BlockSpec((1, H), lambda i: (0, 0)),                # b5
            pl.BlockSpec((2 * H, 2), lambda i: (0, 0)),            # w36
            pl.BlockSpec((1, 2), lambda i: (0, 0)),                # b36
        ],
        out_specs=pl.BlockSpec((block_b, 2), lambda i: (i, 0)),
        compiler_params=pltpu.CompilerParams(
            dimension_semantics=("parallel",)),
        cost_estimate=cost,
    )(x, w14, b14, w2, b2, w5, b5, w36, b36)

    return q[:, 0:1], q[:, 1:2]


def init_params(key, state_dim, action_dim, hidden=256):
    """Deterministic init mimicking nn.Linear (uniform ±1/sqrt(fan_in))."""
    d_in = state_dim + action_dim
    shapes = [
        ("w1", (d_in, hidden)), ("b1", (1, hidden)),
        ("w2", (hidden, hidden)), ("b2", (1, hidden)),
        ("w3", (hidden, 1)), ("b3", (1, 1)),
        ("w4", (d_in, hidden)), ("b4", (1, hidden)),
        ("w5", (hidden, hidden)), ("b5", (1, hidden)),
        ("w6", (hidden, 1)), ("b6", (1, 1)),
    ]
    fan_ins = {"1": d_in, "2": hidden, "3": hidden,
               "4": d_in, "5": hidden, "6": hidden}
    params = {}
    keys = jax.random.split(key, len(shapes))
    for k, (name, shape) in zip(keys, shapes):
        bound = 1.0 / (fan_ins[name[-1]] ** 0.5)
        params[name] = jax.random.uniform(
            k, shape, dtype=jnp.float32, minval=-bound, maxval=bound)
    return params


def reference_forward(state, action, p):
    """Pure-JAX fp32 reference matching the PyTorch Critic forward."""
    x = jnp.concatenate([state, action], axis=-1)
    h = jnp.maximum(x @ p["w1"] + p["b1"], 0.0)
    h = jnp.maximum(h @ p["w2"] + p["b2"], 0.0)
    q1 = h @ p["w3"] + p["b3"]
    g = jnp.maximum(x @ p["w4"] + p["b4"], 0.0)
    g = jnp.maximum(g @ p["w5"] + p["b5"], 0.0)
    q2 = g @ p["w6"] + p["b6"]
    return q1, q2


if __name__ == "__main__":
    state_dim, action_dim = 16, 8

    key = jax.random.PRNGKey(0)
    k_state, k_action, k_params = jax.random.split(key, 3)
    params = init_params(k_params, state_dim, action_dim)

    # Small single-tile check.
    B = 8
    state = jax.random.normal(k_state, (B, state_dim), dtype=jnp.float32)
    action = jax.random.normal(k_action, (B, action_dim), dtype=jnp.float32)
    q1, q2 = jax.jit(critic_forward)(state, action, params)
    jax.block_until_ready((q1, q2))
    r1, r2 = reference_forward(state, action, params)
    assert q1.shape == (B, 1) and q2.shape == (B, 1)
    # bf16 weights/epilogue with fp32 MXU accumulation -> relaxed tolerance.
    assert jnp.allclose(q1, r1, atol=5e-2, rtol=5e-2)
    assert jnp.allclose(q2, r2, atol=5e-2, rtol=5e-2)

    # Multi-tile check (grid=2 with a ragged last tile) to exercise the pipeline.
    B2 = 48
    state2 = jax.random.normal(k_state, (B2, state_dim), dtype=jnp.float32)
    action2 = jax.random.normal(k_action, (B2, action_dim), dtype=jnp.float32)
    fwd_tiled = jax.jit(functools.partial(critic_forward, block_b=32))
    p1, p2 = fwd_tiled(state2, action2, params)
    jax.block_until_ready((p1, p2))
    s1, s2 = reference_forward(state2, action2, params)
    assert p1.shape == (B2, 1) and p2.shape == (B2, 1)
    assert jnp.allclose(p1, s1, atol=5e-2, rtol=5e-2)
    assert jnp.allclose(p2, s2, atol=5e-2, rtol=5e-2)

    print("KERNEL_OK")
</pallas_src>

<mosaic_0001>
module attributes {stable_mosaic.version = 11 : i64} {
  func.func @_critic_kernel(%arg0: i32, %arg1: memref<8x24xf32, #tpu.memory_space<vmem>>, %arg2: memref<24x512xbf16, #tpu.memory_space<vmem>>, %arg3: memref<1x512xbf16, #tpu.memory_space<vmem>>, %arg4: memref<256x256xbf16, #tpu.memory_space<vmem>>, %arg5: memref<1x256xbf16, #tpu.memory_space<vmem>>, %arg6: memref<256x256xbf16, #tpu.memory_space<vmem>>, %arg7: memref<1x256xbf16, #tpu.memory_space<vmem>>, %arg8: memref<512x2xbf16, #tpu.memory_space<vmem>>, %arg9: memref<1x2xf32, #tpu.memory_space<vmem>>, %arg10: memref<8x2xf32, #tpu.memory_space<vmem>>) attributes {dimension_semantics = [#tpu.dimension_semantics<parallel>], iteration_bounds = array<i64: 1>, scalar_prefetch = 0 : i64, scratch_operands = 0 : i64, tpu.core_type = #tpu.core_type<tc>, window_params = [{transform_indices = @transform_0, window_bounds = array<i64: 8, 24>}, {pipeline_mode = #tpu.pipeline_mode<synchronous>, transform_indices = @transform_1, window_bounds = array<i64: 24, 512>}, {pipeline_mode = #tpu.pipeline_mode<synchronous>, transform_indices = @transform_2, window_bounds = array<i64: 1, 512>}, {pipeline_mode = #tpu.pipeline_mode<synchronous>, transform_indices = @transform_3, window_bounds = array<i64: 256, 256>}, {pipeline_mode = #tpu.pipeline_mode<synchronous>, transform_indices = @transform_4, window_bounds = array<i64: 1, 256>}, {pipeline_mode = #tpu.pipeline_mode<synchronous>, transform_indices = @transform_5, window_bounds = array<i64: 256, 256>}, {pipeline_mode = #tpu.pipeline_mode<synchronous>, transform_indices = @transform_6, window_bounds = array<i64: 1, 256>}, {pipeline_mode = #tpu.pipeline_mode<synchronous>, transform_indices = @transform_7, window_bounds = array<i64: 512, 2>}, {pipeline_mode = #tpu.pipeline_mode<synchronous>, transform_indices = @transform_8, window_bounds = array<i64: 1, 2>}, {transform_indices = @transform_9, window_bounds = array<i64: 8, 2>}]} {
    %c0 = arith.constant 0 : index
    %c0_0 = arith.constant 0 : index
    %0 = vector.load %arg1[%c0, %c0_0] : memref<8x24xf32, #tpu.memory_space<vmem>>, vector<8x24xf32>
    %1 = arith.truncf %0 : vector<8x24xf32> to vector<8x24xbf16>
    %c0_1 = arith.constant 0 : index
    %c0_2 = arith.constant 0 : index
    %2 = vector.load %arg2[%c0_1, %c0_2] : memref<24x512xbf16, #tpu.memory_space<vmem>>, vector<24x512xbf16>
    %cst = arith.constant dense<0.000000e+00> : vector<8x512xf32>
    %3 = tpu.matmul %1, %2, %cst {dimension_numbers = #tpu.dot_dimension_numbers<[1], [0], [0], [1], [0, 0, 1, 1], [], []>} : vector<8x24xbf16>, vector<24x512xbf16>, vector<8x512xf32> -> vector<8x512xf32>
    %4 = arith.truncf %3 : vector<8x512xf32> to vector<8x512xbf16>
    %c0_3 = arith.constant 0 : index
    %c0_4 = arith.constant 0 : index
    %5 = vector.load %arg3[%c0_3, %c0_4] : memref<1x512xbf16, #tpu.memory_space<vmem>>, vector<1x512xbf16>
    %6 = vector.broadcast %5 : vector<1x512xbf16> to vector<8x512xbf16>
    %7 = arith.addf %4, %6 : vector<8x512xbf16>
    %cst_5 = arith.constant 0.000000e+00 : bf16
    %8 = vector.broadcast %cst_5 : bf16 to vector<8x512xbf16>
    %9 = arith.maximumf %7, %8 : vector<8x512xbf16>
    %10 = vector.extract_strided_slice %9 {offsets = [0, 0], sizes = [8, 256], strides = [1, 1]} : vector<8x512xbf16> to vector<8x256xbf16>
    %11 = vector.extract_strided_slice %9 {offsets = [0, 256], sizes = [8, 256], strides = [1, 1]} : vector<8x512xbf16> to vector<8x256xbf16>
    %c0_6 = arith.constant 0 : index
    %c0_7 = arith.constant 0 : index
    %12 = vector.load %arg4[%c0_6, %c0_7] : memref<256x256xbf16, #tpu.memory_space<vmem>>, vector<256x256xbf16>
    %cst_8 = arith.constant dense<0.000000e+00> : vector<8x256xf32>
    %13 = tpu.matmul %10, %12, %cst_8 {dimension_numbers = #tpu.dot_dimension_numbers<[1], [0], [0], [1], [0, 0, 1, 1], [], []>} : vector<8x256xbf16>, vector<256x256xbf16>, vector<8x256xf32> -> vector<8x256xf32>
    %14 = arith.truncf %13 : vector<8x256xf32> to vector<8x256xbf16>
    %c0_9 = arith.constant 0 : index
    %c0_10 = arith.constant 0 : index
    %15 = vector.load %arg5[%c0_9, %c0_10] : memref<1x256xbf16, #tpu.memory_space<vmem>>, vector<1x256xbf16>
    %16 = vector.broadcast %15 : vector<1x256xbf16> to vector<8x256xbf16>
    %17 = arith.addf %14, %16 : vector<8x256xbf16>
    %cst_11 = arith.constant 0.000000e+00 : bf16
    %18 = vector.broadcast %cst_11 : bf16 to vector<8x256xbf16>
    %19 = arith.maximumf %17, %18 : vector<8x256xbf16>
    %c0_12 = arith.constant 0 : index
    %c0_13 = arith.constant 0 : index
    %20 = vector.load %arg6[%c0_12, %c0_13] : memref<256x256xbf16, #tpu.memory_space<vmem>>, vector<256x256xbf16>
    %cst_14 = arith.constant dense<0.000000e+00> : vector<8x256xf32>
    %21 = tpu.matmul %11, %20, %cst_14 {dimension_numbers = #tpu.dot_dimension_numbers<[1], [0], [0], [1], [0, 0, 1, 1], [], []>} : vector<8x256xbf16>, vector<256x256xbf16>, vector<8x256xf32> -> vector<8x256xf32>
    %22 = arith.truncf %21 : vector<8x256xf32> to vector<8x256xbf16>
    %c0_15 = arith.constant 0 : index
    %c0_16 = arith.constant 0 : index
    %23 = vector.load %arg7[%c0_15, %c0_16] : memref<1x256xbf16, #tpu.memory_space<vmem>>, vector<1x256xbf16>
    %24 = vector.broadcast %23 : vector<1x256xbf16> to vector<8x256xbf16>
    %25 = arith.addf %22, %24 : vector<8x256xbf16>
    %cst_17 = arith.constant 0.000000e+00 : bf16
    %26 = vector.broadcast %cst_17 : bf16 to vector<8x256xbf16>
    %27 = arith.maximumf %25, %26 : vector<8x256xbf16>
    %28 = tpu.concatenate %19, %27 in 1 : vector<8x256xbf16>, vector<8x256xbf16> -> vector<8x512xbf16>
    %c0_18 = arith.constant 0 : index
    %c0_19 = arith.constant 0 : index
    %29 = vector.load %arg8[%c0_18, %c0_19] : memref<512x2xbf16, #tpu.memory_space<vmem>>, vector<512x2xbf16>
    %cst_20 = arith.constant dense<0.000000e+00> : vector<8x2xf32>
    %30 = tpu.matmul %28, %29, %cst_20 {dimension_numbers = #tpu.dot_dimension_numbers<[1], [0], [0], [1], [0, 0, 1, 1], [], []>} : vector<8x512xbf16>, vector<512x2xbf16>, vector<8x2xf32> -> vector<8x2xf32>
    %c0_21 = arith.constant 0 : index
    %c0_22 = arith.constant 0 : index
    %31 = vector.load %arg9[%c0_21, %c0_22] : memref<1x2xf32, #tpu.memory_space<vmem>>, vector<1x2xf32>
    %32 = vector.broadcast %31 : vector<1x2xf32> to vector<8x2xf32>
    %33 = arith.addf %30, %32 : vector<8x2xf32>
    %c0_23 = arith.constant 0 : index
    %c0_24 = arith.constant 0 : index
    %34 = vector.load %arg10[%c0_23, %c0_24] : memref<8x2xf32, #tpu.memory_space<vmem>>, vector<8x2xf32>
    tpu.vector_store %arg10[%c0_23, %c0_24], %33 {strides = array<i32>} : memref<8x2xf32, #tpu.memory_space<vmem>>, vector<8x2xf32>,
    return
  }
  func.func @transform_0(%arg0: i32) -> (i32, i32) {
    %c0_i32 = arith.constant 0 : i32
    %c0_i32_0 = arith.constant 0 : i32
    return %arg0, %c0_i32 : i32, i32
  }
  func.func @transform_1(%arg0: i32) -> (i32, i32) {
    %c0_i32 = arith.constant 0 : i32
    %c0_i32_0 = arith.constant 0 : i32
    %c0_i32_1 = arith.constant 0 : i32
    return %c0_i32, %c0_i32_0 : i32, i32
  }
  func.func @transform_2(%arg0: i32) -> (i32, i32) {
    %c0_i32 = arith.constant 0 : i32
    %c0_i32_0 = arith.constant 0 : i32
    %c0_i32_1 = arith.constant 0 : i32
    return %c0_i32, %c0_i32_0 : i32, i32
  }
  func.func @transform_3(%arg0: i32) -> (i32, i32) {
    %c0_i32 = arith.constant 0 : i32
    %c0_i32_0 = arith.constant 0 : i32
    %c0_i32_1 = arith.constant 0 : i32
    return %c0_i32, %c0_i32_0 : i32, i32
  }
  func.func @transform_4(%arg0: i32) -> (i32, i32) {
    %c0_i32 = arith.constant 0 : i32
    %c0_i32_0 = arith.constant 0 : i32
    %c0_i32_1 = arith.constant 0 : i32
    return %c0_i32, %c0_i32_0 : i32, i32
  }
  func.func @transform_5(%arg0: i32) -> (i32, i32) {
    %c0_i32 = arith.constant 0 : i32
    %c0_i32_0 = arith.constant 0 : i32
    %c0_i32_1 = arith.constant 0 : i32
    return %c0_i32, %c0_i32_0 : i32, i32
  }
  func.func @transform_6(%arg0: i32) -> (i32, i32) {
    %c0_i32 = arith.constant 0 : i32
    %c0_i32_0 = arith.constant 0 : i32
    %c0_i32_1 = arith.constant 0 : i32
    return %c0_i32, %c0_i32_0 : i32, i32
  }
  func.func @transform_7(%arg0: i32) -> (i32, i32) {
    %c0_i32 = arith.constant 0 : i32
    %c0_i32_0 = arith.constant 0 : i32
    %c0_i32_1 = arith.constant 0 : i32
    return %c0_i32, %c0_i32_0 : i32, i32
  }
  func.func @transform_8(%arg0: i32) -> (i32, i32) {
    %c0_i32 = arith.constant 0 : i32
    %c0_i32_0 = arith.constant 0 : i32
    %c0_i32_1 = arith.constant 0 : i32
    return %c0_i32, %c0_i32_0 : i32, i32
  }
  func.func @transform_9(%arg0: i32) -> (i32, i32) {
    %c0_i32 = arith.constant 0 : i32
    %c0_i32_0 = arith.constant 0 : i32
    return %arg0, %c0_i32 : i32, i32
  }
}

</mosaic_0001>

<bundles_post_ra>
// kernel: critic_forward.1
= control target key start
LH: loop header
LB: loop body
LE: loop exit
PB: predicated region body
PF: predicated region fallthrough
CT: control target
= control target key end

     0   :  { %v1435_v1 = vmov 0   ;;  %vm75_vm0 = vcmask 1043456   ;;  %vm71_vm1 = vcmask 195584   ;;  %vm1133_vm2 = vcmask 15360   ;;  %s1843_s1 = inlined_call_operand.vmem [shape: bf16[24,512], index: 1, kind: input, shape index: {}]   ;;  %s1844_s0 = inlined_call_operand.vmem [shape: f32[8,24], index: 0, kind: input, shape index: {}]   ;;  %s1845_s3 = inlined_call_operand.vmem [shape: bf16[256,256], index: 3, kind: input, shape index: {}]   ;;  %s1846_s5 = inlined_call_operand.vmem [shape: bf16[256,256], index: 5, kind: input, shape index: {}]   ;;  %s1847_s7 = inlined_call_operand.vmem [shape: bf16[512,2], index: 7, kind: input, shape index: {}]   ;;  %s1848_s2 = inlined_call_operand.vmem [shape: bf16[1,512], index: 2, kind: input, shape index: {}]   ;;  %s1849_s4 = inlined_call_operand.vmem [shape: bf16[1,256], index: 4, kind: input, shape index: {}]   ;;  %s1850_s6 = inlined_call_operand.vmem [shape: bf16[1,256], index: 6, kind: input, shape index: {}]   ;;  %s1851_s8 = inlined_call_operand.vmem [shape: f32[1,2], index: 8, kind: input, shape index: {}]   ;;  %s1852_s9 = inlined_call_operand.vmem [shape: f32[8,2], index: 9, kind: output, shape index: {}]  }
   0x1   :  { %v1297_v0 = vld [vmem:[%s1843_s1 + $0x4] ss:$16 sps:$4 sm:$0xff]   ;;  %120 = vmatprep.mubr.bf16.mxu0 %v1435_v1  ;;  %161 = vmatprep.mubr.bf16.mxu1 %v1435_v1  ;;  %v1299_v2 = vld [vmem:[%s1843_s1 + $0xc] ss:$16 sps:$4 sm:$0xff]   ;;  %v1301_v3 = vld [vmem:[%s1843_s1] ss:$16 sps:$4 sm:$0xff]  }
   0x2   :  { %88 = vmatprep.subr.bf16.mxu0 %v1297_v0  ;;  %v1302_v4 = vld [vmem:[%s1843_s1 + $0x8] ss:$16 sps:$4 sm:$0xff]   ;;  %v39_v5 = vld [vmem:[%s1843_s1 + $0x20] sm:$0xff]  ;;  %129 = vmatprep.subr.bf16.mxu1 %v1299_v2  ;;  %v1315_v19 = vld [vmem:[%s1845_s3 + $0x14] ss:$8 sps:$4 sm:$0xff]  }
   0x3   :  { %v1144_v6 = vcombine.high %v39_v5, %v39_v5  ;;  %v40_v7 = vld [vmem:[%s1843_s1 + $0x28] sm:$0xff]  ;;  %v1143_v8 = vcombine.low %v39_v5, %v39_v5  ;;  %89 = vmatpush1.bf16.msra.mxu0 %v1301_v3  ;;  %130 = vmatpush1.bf16.msra.mxu1 %v1302_v4  ;;  %v33_v11 = vld [vmem:[%s1844_s0] sm:$0xff]  ;;  %v1318_v20 = vld [vmem:[%s1846_s5 + $0x14] ss:$8 sps:$4 sm:$0xff]  }
   0x4   :  { %v1146_v9 = vcombine.high %v40_v7, %v40_v7  ;;  %v1145_v10 = vcombine.low %v40_v7, %v40_v7  ;;  %v1309_v13 = vld [vmem:[%s1845_s3 + $0x4] ss:$8 sps:$4 sm:$0xff]   ;;  %v34_v16 = vpack.c.bf16 %v33_v11, %v33_v11  ;;  %v1307_v17 = vld [vmem:[%s1845_s3] ss:$8 sps:$4 sm:$0xff]   ;;  %v1313_v21 = vld [vmem:[%s1845_s3 + $0x10] ss:$8 sps:$4 sm:$0xff]  }
   0x5   :  { %1147 = vmatprep.subr.msk.bf16.mxu0 %vm75_vm0, %v1144_v6  ;;  %v77_v12 = vsel %vm75_vm0, %v1143_v8, 0  ;;  %v1312_v15 = vld [vmem:[%s1846_s5 + $0x4] ss:$8 sps:$4 sm:$0xff]   ;;  %v1310_v18 = vld [vmem:[%s1846_s5] ss:$8 sps:$4 sm:$0xff]  }
   0x6   :  { %1149 = vmatprep.subr.msk.bf16.mxu1 %vm75_vm0, %v1146_v9  ;;  %v83_v14 = vsel %vm75_vm0, %v1145_v10, 0  ;;  %v1316_v22 = vld [vmem:[%s1846_s5 + $0x10] ss:$8 sps:$4 sm:$0xff]   ;;  %v1321_v23 = vld [vmem:[%s1845_s3 + $0x24] ss:$8 sps:$4 sm:$0xff]  }
   0x7   :  { %91 = vmatpush1.bf16.msra.mxu0 %v77_v12  ;;  %132 = vmatpush1.bf16.msra.mxu1 %v83_v14  ;;  %v1324_v24 = vld [vmem:[%s1846_s5 + $0x24] ss:$8 sps:$4 sm:$0xff]   ;;  %v1319_v25 = vld [vmem:[%s1845_s3 + $0x20] ss:$8 sps:$4 sm:$0xff]   ;;  %v1327_v27 = vld [vmem:[%s1845_s3 + $0x34] ss:$8 sps:$4 sm:$0xff]  }
   0x8   :  { %428 = vmatprep.subr.bf16.mxu0 %v1309_v13  ;;  %705 = vmatprep.subr.bf16.mxu1 %v1312_v15  ;;  %v1322_v26 = vld [vmem:[%s1846_s5 + $0x20] ss:$8 sps:$4 sm:$0xff]   ;;  %v1330_v28 = vld [vmem:[%s1846_s5 + $0x34] ss:$8 sps:$4 sm:$0xff]   ;;  %v1325_v29 = vld [vmem:[%s1845_s3 + $0x30] ss:$8 sps:$4 sm:$0xff]  }
   0x9   :  { %v1328_v30 = vld [vmem:[%s1846_s5 + $0x30] ss:$8 sps:$4 sm:$0xff]   ;;  %v1333_v31 = vld [vmem:[%s1845_s3 + $0x44] ss:$8 sps:$4 sm:$0xff]   ;;  %v1331_v33 = vld [vmem:[%s1845_s3 + $0x40] ss:$8 sps:$4 sm:$0xff]  }
   0xa   :  { %1148 = vmatmul.mubr.msk.bf16.vlgmr.msra.gmra.mrb[0].mxu0 %vm71_vm1, %v34_v16  ;;  %1150 = vmatmul.mubr.msk.bf16.vlgmr.msra.gmra.mrb[0].mxu1 %vm71_vm1, %v34_v16  ;;  %v1336_v32 = vld [vmem:[%s1846_s5 + $0x44] ss:$8 sps:$4 sm:$0xff]   ;;  %v1334_v34 = vld [vmem:[%s1846_s5 + $0x40] ss:$8 sps:$4 sm:$0xff]   ;;  %v1339_v35 = vld [vmem:[%s1845_s3 + $0x54] ss:$8 sps:$4 sm:$0xff]  }
   0xb   :  { %429 = vmatpush1.bf16.msra.mxu0 %v1307_v17  ;;  %706 = vmatpush1.bf16.msra.mxu1 %v1310_v18  ;;  %v1342_v36 = vld [vmem:[%s1846_s5 + $0x54] ss:$8 sps:$4 sm:$0xff]   ;;  %v1337_v37 = vld [vmem:[%s1845_s3 + $0x50] ss:$8 sps:$4 sm:$0xff]   ;;  %v1345_v39 = vld [vmem:[%s1845_s3 + $0x64] ss:$8 sps:$4 sm:$0xff]  }
   0xc   :  { %430 = vmatprep.subr.bf16.mxu0 %v1315_v19  ;;  %707 = vmatprep.subr.bf16.mxu1 %v1318_v20  ;;  %v1340_v38 = vld [vmem:[%s1846_s5 + $0x50] ss:$8 sps:$4 sm:$0xff]   ;;  %v1348_v40 = vld [vmem:[%s1846_s5 + $0x64] ss:$8 sps:$4 sm:$0xff]   ;;  %v1343_v41 = vld [vmem:[%s1845_s3 + $0x60] ss:$8 sps:$4 sm:$0xff]   ;;  %v187_v20 = vlaneseq }
   0xd   :  { %v1346_v42 = vld [vmem:[%s1846_s5 + $0x60] ss:$8 sps:$4 sm:$0xff]   ;;  %v1351_v43 = vld [vmem:[%s1845_s3 + $0x74] ss:$8 sps:$4 sm:$0xff]   ;;  %v1349_v45 = vld [vmem:[%s1845_s3 + $0x70] ss:$8 sps:$4 sm:$0xff]  }
   0xe   :  { %v1354_v44 = vld [vmem:[%s1846_s5 + $0x74] ss:$8 sps:$4 sm:$0xff]   ;;  %v1352_v46 = vld [vmem:[%s1846_s5 + $0x70] ss:$8 sps:$4 sm:$0xff]   ;;  %v1357_v47 = vld [vmem:[%s1845_s3 + $0x84] ss:$8 sps:$4 sm:$0xff]  }
   0xf   :  { %431 = vmatpush1.bf16.msra.mxu0 %v1313_v21  ;;  %708 = vmatpush1.bf16.msra.mxu1 %v1316_v22  ;;  %v1360_v48 = vld [vmem:[%s1846_s5 + $0x84] ss:$8 sps:$4 sm:$0xff]   ;;  %v1355_v49 = vld [vmem:[%s1845_s3 + $0x80] ss:$8 sps:$4 sm:$0xff]   ;;  %v1363_v51 = vld [vmem:[%s1845_s3 + $0x94] ss:$8 sps:$4 sm:$0xff]  }
  0x10   :  { %432 = vmatprep.subr.bf16.mxu0 %v1321_v23  ;;  %709 = vmatprep.subr.bf16.mxu1 %v1324_v24  ;;  %v1358_v50 = vld [vmem:[%s1846_s5 + $0x80] ss:$8 sps:$4 sm:$0xff]   ;;  %v1366_v52 = vld [vmem:[%s1846_s5 + $0x94] ss:$8 sps:$4 sm:$0xff]   ;;  %v1361_v53 = vld [vmem:[%s1845_s3 + $0x90] ss:$8 sps:$4 sm:$0xff]  }
  0x11   :  { %v1364_v54 = vld [vmem:[%s1846_s5 + $0x90] ss:$8 sps:$4 sm:$0xff]   ;;  %v1369_v55 = vld [vmem:[%s1845_s3 + $0xa4] ss:$8 sps:$4 sm:$0xff]   ;;  %v1367_v57 = vld [vmem:[%s1845_s3 + $0xa0] ss:$8 sps:$4 sm:$0xff]  }
  0x12   :  { %v1372_v56 = vld [vmem:[%s1846_s5 + $0xa4] ss:$8 sps:$4 sm:$0xff]   ;;  %v1370_v58 = vld [vmem:[%s1846_s5 + $0xa0] ss:$8 sps:$4 sm:$0xff]   ;;  %v1375_v59 = vld [vmem:[%s1845_s3 + $0xb4] ss:$8 sps:$4 sm:$0xff]  }
  0x13   :  { %433 = vmatpush1.bf16.msra.mxu0 %v1319_v25  ;;  %710 = vmatpush1.bf16.msra.mxu1 %v1322_v26  ;;  %v1378_v60 = vld [vmem:[%s1846_s5 + $0xb4] ss:$8 sps:$4 sm:$0xff]   ;;  %v1373_v61 = vld [vmem:[%s1845_s3 + $0xb0] ss:$8 sps:$4 sm:$0xff]   ;;  %v1381_v63 = vld [vmem:[%s1845_s3 + $0xc4] ss:$8 sps:$4 sm:$0xff]  }
  0x14   :  { %434 = vmatprep.subr.bf16.mxu0 %v1327_v27  ;;  %711 = vmatprep.subr.bf16.mxu1 %v1330_v28  ;;  %v1376_v62 = vld [vmem:[%s1846_s5 + $0xb0] ss:$8 sps:$4 sm:$0xff]   ;;  %v1384_v0 = vld [vmem:[%s1846_s5 + $0xc4] ss:$8 sps:$4 sm:$0xff]   ;;  %v1379_v2 = vld [vmem:[%s1845_s3 + $0xc0] ss:$8 sps:$4 sm:$0xff]  }
  0x15   :  { %v1382_v3 = vld [vmem:[%s1846_s5 + $0xc0] ss:$8 sps:$4 sm:$0xff]   ;;  %v1387_v4 = vld [vmem:[%s1845_s3 + $0xd4] ss:$8 sps:$4 sm:$0xff]   ;;  %v1385_v6 = vld [vmem:[%s1845_s3 + $0xd0] ss:$8 sps:$4 sm:$0xff]  }
  0x16   :  { %v1390_v5 = vld [vmem:[%s1846_s5 + $0xd4] ss:$8 sps:$4 sm:$0xff]   ;;  %v1388_v7 = vld [vmem:[%s1846_s5 + $0xd0] ss:$8 sps:$4 sm:$0xff]   ;;  %v1393_v8 = vld [vmem:[%s1845_s3 + $0xe4] ss:$8 sps:$4 sm:$0xff]  }
  0x17   :  { %435 = vmatpush1.bf16.msra.mxu0 %v1325_v29  ;;  %712 = vmatpush1.bf16.msra.mxu1 %v1328_v30  ;;  %v1396_v9 = vld [vmem:[%s1846_s5 + $0xe4] ss:$8 sps:$4 sm:$0xff]   ;;  %v1391_v10 = vld [vmem:[%s1845_s3 + $0xe0] ss:$8 sps:$4 sm:$0xff]   ;;  %v1399_v12 = vld [vmem:[%s1845_s3 + $0xf4] ss:$8 sps:$4 sm:$0xff]  }
  0x18   :  { %436 = vmatprep.subr.bf16.mxu0 %v1333_v31  ;;  %713 = vmatprep.subr.bf16.mxu1 %v1336_v32  ;;  %v1394_v11 = vld [vmem:[%s1846_s5 + $0xe0] ss:$8 sps:$4 sm:$0xff]   ;;  %v1402_v13 = vld [vmem:[%s1846_s5 + $0xf4] ss:$8 sps:$4 sm:$0xff]   ;;  %v1397_v14 = vld [vmem:[%s1845_s3 + $0xf0] ss:$8 sps:$4 sm:$0xff]  }
  0x19   :  { %v1400_v15 = vld [vmem:[%s1846_s5 + $0xf0] ss:$8 sps:$4 sm:$0xff]   ;;  %v1403_v16 = vld [vmem:[%s1847_s7 + $0x40] sm:$0xff]   ;;  %v1436_v18 = vmov 1966171168   ;;  %v188_v22 = vshrl.u32 %v187_v20, 7 }
  0x1a   :  { %v1404_v17 = vld [vmem:[%s1847_s7 + $0xc0] sm:$0xff]   ;;  %v185_v19 = vunpack.c.l.s4 %v1436_v18  ;;  %v1427_v18 = vld [vmem:[%s1847_s7 + $0x70] sm:$0xff]  }
  0x1b   :  { %437 = vmatpush1.bf16.msra.mxu0 %v1331_v33  ;;  %714 = vmatpush1.bf16.msra.mxu1 %v1334_v34  ;;  %v1151_v23 = vld.sshfl [vmem:[%s1848_s2] sm:$0x33 pattern:$0x75316420]  ;;  %v1719_v31 = vsub.s32 0, %v188_v22  ;;  %v1429_v20 = vld [vmem:[%s1847_s7 + $0x30] sm:$0xff]  }
  0x1c   :  { %438 = vmatprep.subr.bf16.mxu0 %v1339_v35  ;;  %715 = vmatprep.subr.bf16.mxu1 %v1342_v36  ;;  %v186_v21 = vunpack.c.0.s8 %v185_v19  ;;  %v183_v25 = vcombine.high %v1151_v23, %v1151_v23  ;;  %v1428_v19 = vld [vmem:[%s1847_s7 + $0xf0] sm:$0xff]  }
  0x1e   :  { %v1715_v24 = vsub.s32 %v186_v21, %v188_v22  ;;  %v1430_v21 = vld [vmem:[%s1847_s7 + $0xb0] sm:$0xff]   ;;  %v1431_v22 = vld [vmem:[%s1847_s7 + $0x78] sm:$0xff]  }
  0x1f   :  { %439 = vmatpush1.bf16.msra.mxu0 %v1337_v37  ;;  %716 = vmatpush1.bf16.msra.mxu1 %v1340_v38 }
  0x20   :  { %440 = vmatprep.subr.bf16.mxu0 %v1345_v39  ;;  %717 = vmatprep.subr.bf16.mxu1 %v1348_v40  ;;  %v190_v26 = vrot.slane %v1151_v23, %v1715_v24  ;;  %v197_v27 = vrot.slane %v183_v25, %v1715_v24  ;;  %v1432_v23 = vld [vmem:[%s1847_s7 + $0xf8] sm:$0xff]  }
  0x21   :  { %v1433_v25 = vld [vmem:[%s1847_s7 + $0x38] sm:$0xff]  }
  0x22   :  { %v198_v28 = vcombine.high %v190_v26, %v190_v26  ;;  %v199_v29 = vcombine.high %v197_v27, %v197_v27  ;;  %v201_v30 = vpack.i.b16 %v190_v26, %v190_v26  ;;  %v208_v33 = vpack.i.b16 %v197_v27, %v197_v27  ;;  %v1434_v26 = vld [vmem:[%s1847_s7 + $0xb8] sm:$0xff]   ;;  %v1184_v27 = vld.sshfl [vmem:[%s1849_s4] sm:$0x11 pattern:$0x75316420] }
  0x23   :  { %441 = vmatpush1.bf16.msra.mxu0 %v1343_v41  ;;  %718 = vmatpush1.bf16.msra.mxu1 %v1346_v42 }
  0x24   :  { %442 = vmatprep.subr.bf16.mxu0 %v1351_v43  ;;  %719 = vmatprep.subr.bf16.mxu1 %v1354_v44  ;;  %v215_v32 = vpack.i.b16 %v198_v28, %v198_v28  ;;  %v222_v34 = vpack.i.b16 %v199_v29, %v199_v29  ;;  %v206_v35 = vrot.slane %v201_v30, %v1719_v31  ;;  %v1217_v28 = vld.sshfl [vmem:[%s1850_s6] sm:$0x11 pattern:$0x75316420] }
  0x25   :  { %v213_v39 = vrot.slane %v208_v33, %v1719_v31  ;;  %v480_v29 = vcombine.high %v1184_v27, %v1184_v27  ;;  %v757_v30 = vcombine.high %v1217_v28, %v1217_v28  ;;  %v764_v33 = vrot.slane %v1217_v28, %v1715_v24 }
  0x26   :  { %v220_v36 = vrot.slane %v215_v32, %v1719_v31  ;;  %v227_v40 = vrot.slane %v222_v34, %v1719_v31  ;;  %v487_v32 = vrot.slane %v1184_v27, %v1715_v24 }
  0x27   :  { %443 = vmatpush1.bf16.msra.mxu0 %v1349_v45  ;;  %720 = vmatpush1.bf16.msra.mxu1 %v1352_v46  ;;  %v494_v34 = vrot.slane %v480_v29, %v1715_v24 }
  0x28   :  { %444 = vmatprep.subr.bf16.mxu0 %v1357_v47  ;;  %721 = vmatprep.subr.bf16.mxu1 %v1360_v48 }
  0x2b   :  { %445 = vmatpush1.bf16.msra.mxu0 %v1355_v49  ;;  %722 = vmatpush1.bf16.msra.mxu1 %v1358_v50 }
  0x2c   :  { %446 = vmatprep.subr.bf16.mxu0 %v1363_v51  ;;  %723 = vmatprep.subr.bf16.mxu1 %v1366_v52 }
  0x2f   :  { %447 = vmatpush1.bf16.msra.mxu0 %v1361_v53  ;;  %724 = vmatpush1.bf16.msra.mxu1 %v1364_v54 }
  0x30   :  { %448 = vmatprep.subr.bf16.mxu0 %v1369_v55  ;;  %725 = vmatprep.subr.bf16.mxu1 %v1372_v56 }
  0x33   :  { %449 = vmatpush1.bf16.msra.mxu0 %v1367_v57  ;;  %726 = vmatpush1.bf16.msra.mxu1 %v1370_v58  ;;  %v1405_v58 = vld [vmem:[%s1847_s7] sm:$0xff]  }
  0x34   :  { %450 = vmatprep.subr.bf16.mxu0 %v1375_v59  ;;  %727 = vmatprep.subr.bf16.mxu1 %v1378_v60  ;;  %v1406_v59 = vld [vmem:[%s1847_s7 + $0x80] sm:$0xff]  }
  0x37   :  { %451 = vmatpush1.bf16.msra.mxu0 %v1373_v61  ;;  %728 = vmatpush1.bf16.msra.mxu1 %v1376_v62  ;;  %v1407_v61 = vld [vmem:[%s1847_s7 + $0x48] sm:$0xff]  }
  0x38   :  { %452 = vmatprep.subr.bf16.mxu0 %v1381_v63  ;;  %729 = vmatprep.subr.bf16.mxu1 %v1384_v0  ;;  %v1408_v62 = vld [vmem:[%s1847_s7 + $0xc8] sm:$0xff]  }
  0x39   :  { %v1409_v63 = vld [vmem:[%s1847_s7 + $0x8] sm:$0xff]  }
  0x3a   :  { %v1410_v0 = vld [vmem:[%s1847_s7 + $0x88] sm:$0xff]  }
  0x3b   :  { %453 = vmatpush1.bf16.msra.mxu0 %v1379_v2  ;;  %730 = vmatpush1.bf16.msra.mxu1 %v1382_v3  ;;  %v1411_v2 = vld [vmem:[%s1847_s7 + $0x50] sm:$0xff]  }
  0x3c   :  { %454 = vmatprep.subr.bf16.mxu0 %v1387_v4  ;;  %731 = vmatprep.subr.bf16.mxu1 %v1390_v5  ;;  %v1412_v3 = vld [vmem:[%s1847_s7 + $0xd0] sm:$0xff]  }
  0x3d   :  { %v1413_v4 = vld [vmem:[%s1847_s7 + $0x10] sm:$0xff]  }
  0x3e   :  { %v1414_v5 = vld [vmem:[%s1847_s7 + $0x90] sm:$0xff]  }
  0x3f   :  { %455 = vmatpush1.bf16.msra.mxu0 %v1385_v6  ;;  %732 = vmatpush1.bf16.msra.mxu1 %v1388_v7  ;;  %v1415_v6 = vld [vmem:[%s1847_s7 + $0x58] sm:$0xff]  }
  0x40   :  { %456 = vmatprep.subr.bf16.mxu0 %v1393_v8  ;;  %733 = vmatprep.subr.bf16.mxu1 %v1396_v9  ;;  %v1416_v7 = vld [vmem:[%s1847_s7 + $0xd8] sm:$0xff]  }
  0x41   :  { %v1417_v8 = vld [vmem:[%s1847_s7 + $0x18] sm:$0xff]  }
  0x42   :  { %v1418_v9 = vld [vmem:[%s1847_s7 + $0x98] sm:$0xff]  }
  0x43   :  { %457 = vmatpush1.bf16.msra.mxu0 %v1391_v10  ;;  %734 = vmatpush1.bf16.msra.mxu1 %v1394_v11  ;;  %v1419_v10 = vld [vmem:[%s1847_s7 + $0x60] sm:$0xff]  }
  0x44   :  { %458 = vmatprep.subr.bf16.mxu0 %v1399_v12  ;;  %735 = vmatprep.subr.bf16.mxu1 %v1402_v13  ;;  %v1420_v11 = vld [vmem:[%s1847_s7 + $0xe0] sm:$0xff]  }
  0x45   :  { %v1421_v12 = vld [vmem:[%s1847_s7 + $0x20] sm:$0xff]  }
  0x46   :  { %v1422_v13 = vld [vmem:[%s1847_s7 + $0xa0] sm:$0xff]  }
  0x47   :  { %459 = vmatpush1.bf16.msra.mxu0 %v1397_v14  ;;  %736 = vmatpush1.bf16.msra.mxu1 %v1400_v15  ;;  %v1423_v14 = vld [vmem:[%s1847_s7 + $0x68] sm:$0xff]  }
  0x48   :  { %1251 = vmatprep.subr.bf16.mxu0 %v1403_v16  ;;  %1273 = vmatprep.subr.bf16.mxu1 %v1404_v17  ;;  %v1424_v15 = vld [vmem:[%s1847_s7 + $0xe8] sm:$0xff]  }
  0x49   :  { %v1425_v16 = vld [vmem:[%s1847_s7 + $0x28] sm:$0xff]  }
  0x4a   :  { %v1426_v17 = vld [vmem:[%s1847_s7 + $0xa8] sm:$0xff]  }
  0xdd   :  { %v122_v37 = vpop.f32.mrb[0].mxu0  ;;  %v163_v38 = vpop.f32.mrb[0].mxu1 }
  0xde   :  { %v170_v41 = vpack.c.bf16 %v122_v37, %v122_v37  ;;  %v172_v42 = vpack.c.bf16 %v163_v38, %v163_v38  ;;  %v124_v43 = vpop.f32.mrb[1].mxu0  ;;  %v165_v44 = vpop.f32.mrb[1].mxu1  ;;  %v773_v37 = vpack.i.b16 %v764_v33, %v764_v33  ;;  %v503_v38 = vpack.i.b16 %v494_v34, %v494_v34 }
  0xdf   :  { %v171_v45 = vpack.c.bf16 %v124_v43, %v124_v43  ;;  %v173_v46 = vpack.c.bf16 %v165_v44, %v165_v44  ;;  %v126_v47 = vpop.f32.mrb[2].mxu0  ;;  %v167_v48 = vpop.f32.mrb[2].mxu1 }
  0xe0   :  { %v228_v49 = vadd.bf16 %v206_v35, %v170_v41  ;;  %v230_v50 = vadd.bf16 %v220_v36, %v172_v42  ;;  %v127_v51 = vpop.f32.mrb[3].mxu0  ;;  %v168_v52 = vpop.f32.mrb[3].mxu1  ;;  %v771_v35 = vrot.slane %v757_v30, %v1715_v24  ;;  %v496_v36 = vpack.i.b16 %v487_v32, %v487_v32 }
  0xe1   :  { %v229_v53 = vadd.bf16 %v213_v39, %v171_v45  ;;  %v231_v54 = vadd.bf16 %v227_v40, %v173_v46  ;;  %v778_v41 = vrot.slane %v773_v37, %v1719_v31  ;;  %v508_v44 = vrot.slane %v503_v38, %v1719_v31 }
  0xe2   :  { %v234_v55 = vmax.bf16 %v1435_v1, %v230_v50  ;;  %v232_v60 = vmax.bf16 %v1435_v1, %v228_v49  ;;  %v780_v39 = vpack.i.b16 %v771_v35, %v771_v35  ;;  %v501_v40 = vrot.slane %v496_v36, %v1719_v31 }
  0xe3   :  { %v233_v56 = vmax.bf16 %v1435_v1, %v229_v53  ;;  %v235_v57 = vmax.bf16 %v1435_v1, %v231_v54 }
  0xe4   :  { %v785_v45 = vrot.slane %v780_v39, %v1719_v31 }
  0xe5   :  { %460 = vmatprep.mubr.bf16.mxu0 %v233_v56  ;;  %737 = vmatprep.mubr.bf16.mxu1 %v235_v57 }
  0xe6   :  { %461 = vmatmul.mubr.bf16.vlgmr.msra.gmra.mrb[4].mxu0 %v232_v60  ;;  %738 = vmatmul.mubr.bf16.vlgmr.msra.gmra.mrb[4].mxu1 %v234_v55 }
  0xe7   :  { %1252 = vmatpush3.bf16.msra.mxu0 %v1405_v58  ;;  %1274 = vmatpush3.bf16.msra.mxu1 %v1406_v59 }
  0xe8   :  { %1253 = vmatprep.subr.bf16.mxu0 %v1407_v61  ;;  %1275 = vmatprep.subr.bf16.mxu1 %v1408_v62 }
  0xeb   :  { %1254 = vmatpush3.bf16.msra.mxu0 %v1409_v63  ;;  %1276 = vmatpush3.bf16.msra.mxu1 %v1410_v0  ;;  %v1218_v0 = vld [vmem:[%s1851_s8] ss:$0 sm:$0xff] }
  0xec   :  { %1255 = vmatprep.subr.bf16.mxu0 %v1411_v2  ;;  %1277 = vmatprep.subr.bf16.mxu1 %v1412_v3 }
  0xef   :  { %1256 = vmatpush3.bf16.msra.mxu0 %v1413_v4  ;;  %1278 = vmatpush3.bf16.msra.mxu1 %v1414_v5 }
  0xf0   :  { %1257 = vmatprep.subr.bf16.mxu0 %v1415_v6  ;;  %1279 = vmatprep.subr.bf16.mxu1 %v1416_v7 }
  0xf3   :  { %1258 = vmatpush3.bf16.msra.mxu0 %v1417_v8  ;;  %1280 = vmatpush3.bf16.msra.mxu1 %v1418_v9 }
  0xf4   :  { %1259 = vmatprep.subr.bf16.mxu0 %v1419_v10  ;;  %1281 = vmatprep.subr.bf16.mxu1 %v1420_v11 }
  0xf7   :  { %1260 = vmatpush3.bf16.msra.mxu0 %v1421_v12  ;;  %1282 = vmatpush3.bf16.msra.mxu1 %v1422_v13 }
  0xf8   :  { %1261 = vmatprep.subr.bf16.mxu0 %v1423_v14  ;;  %1283 = vmatprep.subr.bf16.mxu1 %v1424_v15 }
  0xfb   :  { %1262 = vmatpush3.bf16.msra.mxu0 %v1425_v16  ;;  %1284 = vmatpush3.bf16.msra.mxu1 %v1426_v17 }
  0xfc   :  { %1263 = vmatprep.subr.bf16.mxu0 %v1427_v18  ;;  %1285 = vmatprep.subr.bf16.mxu1 %v1428_v19 }
  0xff   :  { %1264 = vmatpush3.bf16.msra.mxu0 %v1429_v20  ;;  %1286 = vmatpush3.bf16.msra.mxu1 %v1430_v21 }
 0x100   :  { %1265 = vmatprep.subr.bf16.mxu0 %v1431_v22  ;;  %1287 = vmatprep.subr.bf16.mxu1 %v1432_v23 }
 0x103   :  { %1266 = vmatpush3.bf16.msra.mxu0 %v1433_v25  ;;  %1288 = vmatpush3.bf16.msra.mxu1 %v1434_v26 }
 0x1b9   :  { %v462_v42 = vpop.f32.mrb[4].mxu0  ;;  %v739_v43 = vpop.f32.mrb[4].mxu1 }
 0x1ba   :  { %v469_v46 = vpack.c.bf16 %v462_v42, %v462_v42  ;;  %v746_v47 = vpack.c.bf16 %v739_v43, %v739_v43  ;;  %v464_v48 = vpop.f32.mrb[5].mxu0  ;;  %v741_v49 = vpop.f32.mrb[5].mxu1 }
 0x1bb   :  { %v470_v50 = vpack.c.bf16 %v464_v48, %v464_v48  ;;  %v747_v24 = vpack.c.bf16 %v741_v49, %v741_v49  ;;  %v466_v51 = vpop.f32.mrb[6].mxu0  ;;  %v743_v52 = vpop.f32.mrb[6].mxu1 }
 0x1bc   :  { %v509_v53 = vadd.bf16 %v501_v40, %v469_v46  ;;  %v786_v54 = vadd.bf16 %v778_v41, %v746_v47  ;;  %v467_v55 = vpop.f32.mrb[7].mxu0  ;;  %v744_v56 = vpop.f32.mrb[7].mxu1 }
 0x1bd   :  { %v510_v57 = vadd.bf16 %v508_v44, %v470_v50  ;;  %v787_v58 = vadd.bf16 %v785_v45, %v747_v24 }
 0x1be   :  { %v511_v31 = vmax.bf16 %v1435_v1, %v509_v53  ;;  %v788_v61 = vmax.bf16 %v1435_v1, %v786_v54 }
 0x1bf   :  { %v512_v59 = vmax.bf16 %v1435_v1, %v510_v57  ;;  %v789_v60 = vmax.bf16 %v1435_v1, %v787_v58 }
 0x1c1   :  { %1085 = vmatprep.mubr.bf16.mxu0 %v512_v59  ;;  %1125 = vmatprep.mubr.bf16.mxu1 %v789_v60 }
 0x1c2   :  { %1086 = vmatmul.mubr.bf16.vlgmr.msra.gmra.mrb[8].mxu0 %v511_v31  ;;  %1126 = vmatmul.mubr.bf16.vlgmr.msra.gmra.mrb[8].mxu1 %v788_v61 }
 0x295   :  { %v1267_v62 = vpop.f32.mrb[8].mxu0  ;;  %v1289_v63 = vpop.f32.mrb[8].mxu1 }
 0x296   :  { %v1268_v2 = vpop.f32.mrb[9].mxu0  ;;  %v1290_v3 = vpop.f32.mrb[9].mxu1 }
 0x297   :  { %v1269_v4 = vadd.f32 %v1268_v2, %v1267_v62  ;;  %v1291_v5 = vadd.f32 %v1290_v3, %v1289_v63  ;;  %v1270_v6 = vpop.f32.mrb[10].mxu0  ;;  %v1292_v7 = vpop.f32.mrb[10].mxu1 }
 0x298   :  { %v1271_v8 = vpop.f32.mrb[11].mxu0  ;;  %v1293_v9 = vpop.f32.mrb[11].mxu1 }
 0x299   :  { %v1088_v10 = vadd.f32 %v1269_v4, %v1218_v0 }
 0x29b   :  { %v1128_v1 = vadd.f32 %v1291_v5, %v1088_v10 }
 0x29d   :  { %1134 = vst.msk [vmem:[%s1852_s9] sm:$0xff] %vm1133_vm2, %v1128_v1 }

</bundles_post_ra>
